<compile_context>
chip_gen: v7x
topology: tpu7x:2x2x1
jax: 0.10.0
libtpu: 0.0.40
codegen_flags: <defaults>
</compile_context>

<pallas_src>
import functools

import jax
import jax.numpy as jnp
from jax.experimental import pallas as pl
from jax.experimental.pallas import tpu as pltpu

HIDDEN = 60          # nn.Linear(obs_size, 60) -> 60 -> 60 -> n_actions
LANE = 128           # TPU lane width
SUBLANE_BF16 = 16    # bf16 sublane packing


def _round_up(n, m):
    return -(-n // m) * m


def _actor_mlp_kernel(x_ref, w1_ref, b1_ref, w2_ref, b2_ref,
                      w3_ref, b3_ref, w4_ref, b4_ref, o_ref):
    """Fused 4-layer MLP for one (agent, batch-tile) grid cell.

    Refs carry a leading size-1 agent-block axis; weights/biases for the
    current agent stay VMEM-resident across the inner batch axis.
    """
    n_actions = o_ref.shape[-1]

    h = x_ref[0]                                              # (tb, obs_p) f32
    h = jnp.dot(h.astype(jnp.bfloat16), w1_ref[0],
                preferred_element_type=jnp.float32) + b1_ref[0]
    h = jnp.maximum(h, 0.0)

    h = jnp.dot(h.astype(jnp.bfloat16), w2_ref[0],
                preferred_element_type=jnp.float32) + b2_ref[0]
    h = jnp.maximum(h, 0.0)

    h = jnp.dot(h.astype(jnp.bfloat16), w3_ref[0],
                preferred_element_type=jnp.float32) + b3_ref[0]
    h = jnp.maximum(h, 0.0)

    h = jnp.dot(h.astype(jnp.bfloat16), w4_ref[0],
                preferred_element_type=jnp.float32) + b4_ref[0]
    # Slice the lane-padded last layer back to the true action width before
    # tanh + store: the output DMA then carries only n_actions columns.
    o_ref[0] = jnp.tanh(h[:, :n_actions])


@functools.partial(jax.jit, static_argnames=("n_actions", "block_b"))
def _actors_forward(x, w1, b1, w2, b2, w3, b3, w4, b4, *, n_actions, block_b):
    A, B, obs = x.shape
    obs_p = w1.shape[1]          # padded contraction dim of layer 1

    # Batch tiling: 16-row multiples, tight padding, and >=2 grid steps when
    # B allows so the "parallel" batch axis shards across v7x megacore.
    ngrid = pl.cdiv(B, block_b)
    if B >= 2 * SUBLANE_BF16:
        ngrid = max(ngrid, 2)
    tb = _round_up(pl.cdiv(B, ngrid), SUBLANE_BF16)
    b_padded = tb * ngrid

    x_p = jnp.pad(x, ((0, 0), (0, b_padded - B), (0, obs_p - obs)))

    def w_spec(arr):  # per-agent block, constant over the inner batch axis
        return pl.BlockSpec((1,) + arr.shape[1:], lambda a, i: (a, 0, 0))

    out = pl.pallas_call(
        _actor_mlp_kernel,
        out_shape=jax.ShapeDtypeStruct((A, b_padded, n_actions), jnp.float32),
        grid=(A, ngrid),
        in_specs=[
            pl.BlockSpec((1, tb, obs_p), lambda a, i: (a, i, 0)),   # x tiles
            w_spec(w1), w_spec(b1), w_spec(w2), w_spec(b2),
            w_spec(w3), w_spec(b3), w_spec(w4), w_spec(b4),
        ],
        out_specs=pl.BlockSpec((1, tb, n_actions), lambda a, i: (a, i, 0)),
        compiler_params=pltpu.CompilerParams(
            dimension_semantics=("arbitrary", "parallel"),   # batch axis -> megacore
            vmem_limit_bytes=32 * 1024 * 1024,               # safe on v5e/v6e/v7x
        ),
    )(x_p, w1, b1, w2, b2, w3, b3, w4, b4)

    return out[:, :B, :]


def prepare_params(params_or_list):
    """Pad + cast + stack parameters ONCE, outside the per-call path.

    Accepts a single params dict (one actor) or a list of dicts (one per
    agent).  Returns stacked arrays with a leading agent axis plus the true
    n_actions / n_agents needed by the forward wrappers.
    """
    plist = [params_or_list] if isinstance(params_or_list, dict) else list(params_or_list)
    obs_size = plist[0]["w1"].shape[0]
    n_actions = plist[0]["w4"].shape[1]

    obs_p = _round_up(obs_size, SUBLANE_BF16)   # bf16-packed contraction dim
    h_p = _round_up(HIDDEN, LANE)               # lane-dense hidden width (128)
    a_p = _round_up(n_actions, LANE)            # lane-dense MXU N for layer 4

    def pad2(m, rows, cols):
        return jnp.pad(m, ((0, rows - m.shape[0]), (0, cols - m.shape[1])))

    def stack(name, rows, cols, dtype):
        return jnp.stack([pad2(p[name], rows, cols) for p in plist]).astype(dtype)

    return {
        "w1": stack("w1", obs_p, h_p, jnp.bfloat16),
        "b1": stack("b1", 1, h_p, jnp.float32),
        "w2": stack("w2", h_p, h_p, jnp.bfloat16),
        "b2": stack("b2", 1, h_p, jnp.float32),
        "w3": stack("w3", h_p, h_p, jnp.bfloat16),
        "b3": stack("b3", 1, h_p, jnp.float32),
        "w4": stack("w4", h_p, a_p, jnp.bfloat16),
        "b4": stack("b4", 1, a_p, jnp.float32),
        "n_actions": int(n_actions),
        "n_agents": len(plist),
    }


def maddpg_actors_forward(x, prepared, *, block_b=2048):
    """All agents fused in one pallas_call. x: (A, B, obs) -> (A, B, n_actions)."""
    assert x.ndim == 3 and x.shape[0] == prepared["n_agents"], x.shape
    return _actors_forward(
        x, prepared["w1"], prepared["b1"], prepared["w2"], prepared["b2"],
        prepared["w3"], prepared["b3"], prepared["w4"], prepared["b4"],
        n_actions=prepared["n_actions"], block_b=block_b)


def maddpg_actor_forward(x, prepared, *, block_b=2048):
    """Single-actor convenience wrapper. x: (B, obs) -> (B, n_actions)."""
    return maddpg_actors_forward(x[None], prepared, block_b=block_b)[0]


def init_params(key, obs_size, n_actions):
    """Deterministic init mimicking PyTorch Linear default (uniform +/-1/sqrt(fan_in))."""
    dims = [(obs_size, HIDDEN), (HIDDEN, HIDDEN), (HIDDEN, HIDDEN), (HIDDEN, n_actions)]
    params = {}
    keys = jax.random.split(key, 2 * len(dims))
    for i, (fan_in, fan_out) in enumerate(dims):
        bound = 1.0 / jnp.sqrt(float(fan_in))
        params[f"w{i+1}"] = jax.random.uniform(
            keys[2 * i], (fan_in, fan_out), jnp.float32, -bound, bound)
        params[f"b{i+1}"] = jax.random.uniform(
            keys[2 * i + 1], (1, fan_out), jnp.float32, -bound, bound)
    return params


def reference_forward(x, params):
    """Pure-JAX reference mirroring the kernel math (bf16 dot inputs, f32 accumulate)."""
    h = x
    for i in (1, 2, 3):
        w = params[f"w{i}"].astype(jnp.bfloat16)
        h = jnp.dot(h.astype(jnp.bfloat16), w,
                    preferred_element_type=jnp.float32) + params[f"b{i}"]
        h = jnp.maximum(h, 0.0)
    w4 = params["w4"].astype(jnp.bfloat16)
    h = jnp.dot(h.astype(jnp.bfloat16), w4,
                preferred_element_type=jnp.float32) + params["b4"]
    return jnp.tanh(h)


if __name__ == "__main__":
    key = jax.random.PRNGKey(0)
    k_x, k_p = jax.random.split(key)

    batch, obs_size, n_actions, n_agents = 8, 24, 4, 3

    # --- single actor -------------------------------------------------------
    x = jax.random.normal(k_x, (batch, obs_size), jnp.float32)
    params = init_params(k_p, obs_size, n_actions)
    prepared = prepare_params(params)                 # pad/cast once, reuse per call

    out = jax.block_until_ready(maddpg_actor_forward(x, prepared))
    ref = reference_forward(x, params)
    assert out.shape == (batch, n_actions), out.shape
    assert jnp.all(jnp.isfinite(out))
    assert jnp.allclose(out, ref, atol=1e-4, rtol=1e-4), float(jnp.max(jnp.abs(out - ref)))

    # --- all agents fused into a single pallas_call -------------------------
    agent_keys = jax.random.split(k_p, n_agents)
    params_list = [init_params(k, obs_size, n_actions) for k in agent_keys]
    prepared_multi = prepare_params(params_list)
    x_multi = jax.random.normal(k_x, (n_agents, batch, obs_size), jnp.float32)

    out_multi = jax.block_until_ready(maddpg_actors_forward(x_multi, prepared_multi))
    assert out_multi.shape == (n_agents, batch, n_actions), out_multi.shape
    for a in range(n_agents):
        ref_a = reference_forward(x_multi[a], params_list[a])
        assert jnp.allclose(out_multi[a], ref_a, atol=1e-4, rtol=1e-4), a

    print("KERNEL_OK")
</pallas_src>

<mosaic_0001>
module attributes {stable_mosaic.version = 11 : i64} {
  func.func @_actor_mlp_kernel(%arg0: i32, %arg1: i32, %arg2: memref<1x16x32xf32, #tpu.memory_space<vmem>>, %arg3: memref<1x32x128xbf16, #tpu.memory_space<vmem>>, %arg4: memref<1x1x128xf32, #tpu.memory_space<vmem>>, %arg5: memref<1x128x128xbf16, #tpu.memory_space<vmem>>, %arg6: memref<1x1x128xf32, #tpu.memory_space<vmem>>, %arg7: memref<1x128x128xbf16, #tpu.memory_space<vmem>>, %arg8: memref<1x1x128xf32, #tpu.memory_space<vmem>>, %arg9: memref<1x128x128xbf16, #tpu.memory_space<vmem>>, %arg10: memref<1x1x128xf32, #tpu.memory_space<vmem>>, %arg11: memref<1x16x4xf32, #tpu.memory_space<vmem>>) attributes {dimension_semantics = [#tpu.dimension_semantics<arbitrary>, #tpu.dimension_semantics<parallel>], iteration_bounds = array<i64: 1, 1>, scalar_prefetch = 0 : i64, scratch_operands = 0 : i64, tpu.core_type = #tpu.core_type<tc>, window_params = [{transform_indices = @transform_0, window_bounds = array<i64: 1, 16, 32>}, {transform_indices = @transform_1, window_bounds = array<i64: 1, 32, 128>}, {transform_indices = @transform_2, window_bounds = array<i64: 1, 1, 128>}, {transform_indices = @transform_3, window_bounds = array<i64: 1, 128, 128>}, {transform_indices = @transform_4, window_bounds = array<i64: 1, 1, 128>}, {transform_indices = @transform_5, window_bounds = array<i64: 1, 128, 128>}, {transform_indices = @transform_6, window_bounds = array<i64: 1, 1, 128>}, {transform_indices = @transform_7, window_bounds = array<i64: 1, 128, 128>}, {transform_indices = @transform_8, window_bounds = array<i64: 1, 1, 128>}, {transform_indices = @transform_9, window_bounds = array<i64: 1, 16, 4>}]} {
    %c0 = arith.constant 0 : index
    %c0_0 = arith.constant 0 : index
    %c0_1 = arith.constant 0 : index
    %0 = vector.load %arg2[%c0, %c0_0, %c0_1] : memref<1x16x32xf32, #tpu.memory_space<vmem>>, vector<1x16x32xf32>
    %1 = vector.shape_cast %0 : vector<1x16x32xf32> to vector<16x32xf32>
    %2 = arith.truncf %1 : vector<16x32xf32> to vector<16x32xbf16>
    %c0_2 = arith.constant 0 : index
    %c0_3 = arith.constant 0 : index
    %c0_4 = arith.constant 0 : index
    %3 = vector.load %arg3[%c0_2, %c0_3, %c0_4] : memref<1x32x128xbf16, #tpu.memory_space<vmem>>, vector<1x32x128xbf16>
    %4 = vector.shape_cast %3 : vector<1x32x128xbf16> to vector<32x128xbf16>
    %cst = arith.constant dense<0.000000e+00> : vector<16x128xf32>
    %5 = tpu.matmul %2, %4, %cst {dimension_numbers = #tpu.dot_dimension_numbers<[1], [0], [0], [1], [0, 0, 1, 1], [], []>} : vector<16x32xbf16>, vector<32x128xbf16>, vector<16x128xf32> -> vector<16x128xf32>
    %c0_5 = arith.constant 0 : index
    %c0_6 = arith.constant 0 : index
    %c0_7 = arith.constant 0 : index
    %6 = vector.load %arg4[%c0_5, %c0_6, %c0_7] : memref<1x1x128xf32, #tpu.memory_space<vmem>>, vector<1x1x128xf32>
    %7 = vector.shape_cast %6 : vector<1x1x128xf32> to vector<1x128xf32>
    %8 = vector.broadcast %7 : vector<1x128xf32> to vector<16x128xf32>
    %9 = arith.addf %5, %8 : vector<16x128xf32>
    %cst_8 = arith.constant 0.000000e+00 : f32
    %10 = vector.broadcast %cst_8 : f32 to vector<16x128xf32>
    %11 = arith.maximumf %9, %10 : vector<16x128xf32>
    %12 = arith.truncf %11 : vector<16x128xf32> to vector<16x128xbf16>
    %c0_9 = arith.constant 0 : index
    %c0_10 = arith.constant 0 : index
    %c0_11 = arith.constant 0 : index
    %13 = vector.load %arg5[%c0_9, %c0_10, %c0_11] : memref<1x128x128xbf16, #tpu.memory_space<vmem>>, vector<1x128x128xbf16>
    %14 = vector.shape_cast %13 : vector<1x128x128xbf16> to vector<128x128xbf16>
    %cst_12 = arith.constant dense<0.000000e+00> : vector<16x128xf32>
    %15 = tpu.matmul %12, %14, %cst_12 {dimension_numbers = #tpu.dot_dimension_numbers<[1], [0], [0], [1], [0, 0, 1, 1], [], []>} : vector<16x128xbf16>, vector<128x128xbf16>, vector<16x128xf32> -> vector<16x128xf32>
    %c0_13 = arith.constant 0 : index
    %c0_14 = arith.constant 0 : index
    %c0_15 = arith.constant 0 : index
    %16 = vector.load %arg6[%c0_13, %c0_14, %c0_15] : memref<1x1x128xf32, #tpu.memory_space<vmem>>, vector<1x1x128xf32>
    %17 = vector.shape_cast %16 : vector<1x1x128xf32> to vector<1x128xf32>
    %18 = vector.broadcast %17 : vector<1x128xf32> to vector<16x128xf32>
    %19 = arith.addf %15, %18 : vector<16x128xf32>
    %cst_16 = arith.constant 0.000000e+00 : f32
    %20 = vector.broadcast %cst_16 : f32 to vector<16x128xf32>
    %21 = arith.maximumf %19, %20 : vector<16x128xf32>
    %22 = arith.truncf %21 : vector<16x128xf32> to vector<16x128xbf16>
    %c0_17 = arith.constant 0 : index
    %c0_18 = arith.constant 0 : index
    %c0_19 = arith.constant 0 : index
    %23 = vector.load %arg7[%c0_17, %c0_18, %c0_19] : memref<1x128x128xbf16, #tpu.memory_space<vmem>>, vector<1x128x128xbf16>
    %24 = vector.shape_cast %23 : vector<1x128x128xbf16> to vector<128x128xbf16>
    %cst_20 = arith.constant dense<0.000000e+00> : vector<16x128xf32>
    %25 = tpu.matmul %22, %24, %cst_20 {dimension_numbers = #tpu.dot_dimension_numbers<[1], [0], [0], [1], [0, 0, 1, 1], [], []>} : vector<16x128xbf16>, vector<128x128xbf16>, vector<16x128xf32> -> vector<16x128xf32>
    %c0_21 = arith.constant 0 : index
    %c0_22 = arith.constant 0 : index
    %c0_23 = arith.constant 0 : index
    %26 = vector.load %arg8[%c0_21, %c0_22, %c0_23] : memref<1x1x128xf32, #tpu.memory_space<vmem>>, vector<1x1x128xf32>
    %27 = vector.shape_cast %26 : vector<1x1x128xf32> to vector<1x128xf32>
    %28 = vector.broadcast %27 : vector<1x128xf32> to vector<16x128xf32>
    %29 = arith.addf %25, %28 : vector<16x128xf32>
    %cst_24 = arith.constant 0.000000e+00 : f32
    %30 = vector.broadcast %cst_24 : f32 to vector<16x128xf32>
    %31 = arith.maximumf %29, %30 : vector<16x128xf32>
    %32 = arith.truncf %31 : vector<16x128xf32> to vector<16x128xbf16>
    %c0_25 = arith.constant 0 : index
    %c0_26 = arith.constant 0 : index
    %c0_27 = arith.constant 0 : index
    %33 = vector.load %arg9[%c0_25, %c0_26, %c0_27] : memref<1x128x128xbf16, #tpu.memory_space<vmem>>, vector<1x128x128xbf16>
    %34 = vector.shape_cast %33 : vector<1x128x128xbf16> to vector<128x128xbf16>
    %cst_28 = arith.constant dense<0.000000e+00> : vector<16x128xf32>
    %35 = tpu.matmul %32, %34, %cst_28 {dimension_numbers = #tpu.dot_dimension_numbers<[1], [0], [0], [1], [0, 0, 1, 1], [], []>} : vector<16x128xbf16>, vector<128x128xbf16>, vector<16x128xf32> -> vector<16x128xf32>
    %c0_29 = arith.constant 0 : index
    %c0_30 = arith.constant 0 : index
    %c0_31 = arith.constant 0 : index
    %36 = vector.load %arg10[%c0_29, %c0_30, %c0_31] : memref<1x1x128xf32, #tpu.memory_space<vmem>>, vector<1x1x128xf32>
    %37 = vector.shape_cast %36 : vector<1x1x128xf32> to vector<1x128xf32>
    %38 = vector.broadcast %37 : vector<1x128xf32> to vector<16x128xf32>
    %39 = arith.addf %35, %38 : vector<16x128xf32>
    %40 = vector.extract_strided_slice %39 {offsets = [0, 0], sizes = [16, 4], strides = [1, 1]} : vector<16x128xf32> to vector<16x4xf32>
    %41 = math.tanh %40 : vector<16x4xf32>
    %c0_32 = arith.constant 0 : index
    %c0_33 = arith.constant 0 : index
    %c0_34 = arith.constant 0 : index
    %42 = vector.load %arg11[%c0_32, %c0_33, %c0_34] : memref<1x16x4xf32, #tpu.memory_space<vmem>>, vector<1x16x4xf32>
    %43 = vector.shape_cast %42 : vector<1x16x4xf32> to vector<16x4xf32>
    %44 = vector.shape_cast %41 : vector<16x4xf32> to vector<1x16x4xf32>
    tpu.vector_store %arg11[%c0_32, %c0_33, %c0_34], %44 {strides = array<i32>} : memref<1x16x4xf32, #tpu.memory_space<vmem>>, vector<1x16x4xf32>,
    return
  }
  func.func @transform_0(%arg0: i32, %arg1: i32) -> (i32, i32, i32) {
    %c0_i32 = arith.constant 0 : i32
    %c0_i32_0 = arith.constant 0 : i32
    return %arg0, %arg1, %c0_i32 : i32, i32, i32
  }
  func.func @transform_1(%arg0: i32, %arg1: i32) -> (i32, i32, i32) {
    %c0_i32 = arith.constant 0 : i32
    %c0_i32_0 = arith.constant 0 : i32
    %c0_i32_1 = arith.constant 0 : i32
    return %arg0, %c0_i32, %c0_i32_0 : i32, i32, i32
  }
  func.func @transform_2(%arg0: i32, %arg1: i32) -> (i32, i32, i32) {
    %c0_i32 = arith.constant 0 : i32
    %c0_i32_0 = arith.constant 0 : i32
    %c0_i32_1 = arith.constant 0 : i32
    return %arg0, %c0_i32, %c0_i32_0 : i32, i32, i32
  }
  func.func @transform_3(%arg0: i32, %arg1: i32) -> (i32, i32, i32) {
    %c0_i32 = arith.constant 0 : i32
    %c0_i32_0 = arith.constant 0 : i32
    %c0_i32_1 = arith.constant 0 : i32
    return %arg0, %c0_i32, %c0_i32_0 : i32, i32, i32
  }
  func.func @transform_4(%arg0: i32, %arg1: i32) -> (i32, i32, i32) {
    %c0_i32 = arith.constant 0 : i32
    %c0_i32_0 = arith.constant 0 : i32
    %c0_i32_1 = arith.constant 0 : i32
    return %arg0, %c0_i32, %c0_i32_0 : i32, i32, i32
  }
  func.func @transform_5(%arg0: i32, %arg1: i32) -> (i32, i32, i32) {
    %c0_i32 = arith.constant 0 : i32
    %c0_i32_0 = arith.constant 0 : i32
    %c0_i32_1 = arith.constant 0 : i32
    return %arg0, %c0_i32, %c0_i32_0 : i32, i32, i32
  }
  func.func @transform_6(%arg0: i32, %arg1: i32) -> (i32, i32, i32) {
    %c0_i32 = arith.constant 0 : i32
    %c0_i32_0 = arith.constant 0 : i32
    %c0_i32_1 = arith.constant 0 : i32
    return %arg0, %c0_i32, %c0_i32_0 : i32, i32, i32
  }
  func.func @transform_7(%arg0: i32, %arg1: i32) -> (i32, i32, i32) {
    %c0_i32 = arith.constant 0 : i32
    %c0_i32_0 = arith.constant 0 : i32
    %c0_i32_1 = arith.constant 0 : i32
    return %arg0, %c0_i32, %c0_i32_0 : i32, i32, i32
  }
  func.func @transform_8(%arg0: i32, %arg1: i32) -> (i32, i32, i32) {
    %c0_i32 = arith.constant 0 : i32
    %c0_i32_0 = arith.constant 0 : i32
    %c0_i32_1 = arith.constant 0 : i32
    return %arg0, %c0_i32, %c0_i32_0 : i32, i32, i32
  }
  func.func @transform_9(%arg0: i32, %arg1: i32) -> (i32, i32, i32) {
    %c0_i32 = arith.constant 0 : i32
    %c0_i32_0 = arith.constant 0 : i32
    return %arg0, %arg1, %c0_i32 : i32, i32, i32
  }
}

</mosaic_0001>

<bundles_post_ra>
// kernel: _actors_forward.1
= control target key start
LH: loop header
LB: loop body
LE: loop exit
PB: predicated region body
PF: predicated region fallthrough
CT: control target
= control target key end

     0   :  { %14 = vsyncpa [#allocation3], 0  ;;  %s910_s0 = inlined_call_operand.vmem [shape: f32[1,16,32], index: 0, kind: input, shape index: {}]   ;;  %s911_s1 = inlined_call_operand.vmem [shape: bf16[1,32,128], index: 1, kind: input, shape index: {}]   ;;  %s912_s2 = inlined_call_operand.vmem [shape: f32[1,1,128], index: 2, kind: input, shape index: {}]   ;;  %s913_s3 = inlined_call_operand.hbm [shape: bf16[1,128,128], index: 3, kind: input, shape index: {}]   ;;  %s914_s4 = inlined_call_operand.vmem [shape: f32[1,1,128], index: 4, kind: input, shape index: {}]   ;;  %s915_s5 = inlined_call_operand.hbm [shape: bf16[1,128,128], index: 5, kind: input, shape index: {}]   ;;  %s916_s6 = inlined_call_operand.vmem [shape: f32[1,1,128], index: 6, kind: input, shape index: {}]   ;;  %s917_s7 = inlined_call_operand.hbm [shape: bf16[1,128,128], index: 7, kind: input, shape index: {}]   ;;  %s918_s8 = inlined_call_operand.vmem [shape: f32[1,1,128], index: 8, kind: input, shape index: {}]   ;;  %s919_s9 = inlined_call_operand.vmem [shape: f32[1,16,4], index: 9, kind: output, shape index: {}]  }
   0x1   :  { %15 = vsyncpa [#allocation5], 0  ;;  %s737_s30 = smov [#allocation4]   ;;  %s738_s11 = smov [#allocation2]  }
   0x2   :  { %s41_s10 = sshll.u32 %s737_s30, 4  ;;  %s27_s12 = sshll.u32 %s738_s11, 4  ;;  %s42_s10 = int_to_ptr.vmem [resolvable:$true] %s41_s10  ;;  %s794_s12 = int_to_ptr.vmem [resolvable:$true] %s27_s12 }
   0x3   :  { %s667_s15 = scalar_lea.hbm %s915_s5, 1024 }
   0x4   :  { %p668_p0 = scmp.ne.s32.totalorder %s915_s5, %s667_s15  ;;  %p671_p1 = scmp.lt.u32.totalorder %s667_s15, %s915_s5 }
   0x6   :  { %p673_p2 = pnand %p671_p1, %p668_p0 }
   0x8   :  { %676 = shalt.err (!%p673_p2)
}
   0x9   :  { %s677_s20 = scalar_lea.vmem %s42_s10, 1024  ;;  %p682_p4 = scmp.lt.s32.totalorder %s42_s10, %s42_s10 }
   0xa   :  { %p678_p3 = scmp.ne.s32.totalorder %s42_s10, %s677_s20  ;;  %p683_p5 = scmp.lt.s32.totalorder %s677_s20, %s677_s20 }
   0xc   :  { %p684_p6 = por %p683_p5, %p682_p4 }
   0xe   :  { %p685_p7 = pnand %p684_p6, %p678_p3 }
  0x10   :  { %688 = shalt.err (!%p685_p7)
}
  0x11   :  { %s739_s21 = smov 64   ;;  %s740_s22 = smov 4  }
  0x12   :  { %47 = dma.hbm_to_vmem [thread:$0]  %s915_s5, 1024, %s42_s10, [#allocation5], %s739_s21, %s739_s21, %s740_s22  }
  0x13   :  { %s689_s27 = scalar_lea.hbm %s913_s3, 1024 }
  0x14   :  { %p690_p8 = scmp.ne.s32.totalorder %s913_s3, %s689_s27  ;;  %p693_p9 = scmp.lt.u32.totalorder %s689_s27, %s913_s3 }
  0x16   :  { %p695_p10 = pnand %p693_p9, %p690_p8 }
  0x18   :  { %698 = shalt.err (!%p695_p10)
}
  0x19   :  { %s699_s13 = scalar_lea.vmem %s794_s12, 1024  ;;  %p704_p12 = scmp.lt.s32.totalorder %s794_s12, %s794_s12 }
  0x1a   :  { %p700_p11 = scmp.ne.s32.totalorder %s794_s12, %s699_s13  ;;  %p705_p13 = scmp.lt.s32.totalorder %s699_s13, %s699_s13 }
  0x1c   :  { %p706_p0 = por %p705_p13, %p704_p12 }
  0x1e   :  { %p707_p1 = pnand %p706_p0, %p700_p11 }
  0x20   :  { %710 = shalt.err (!%p707_p1)
}
  0x21   :  { %33 = dma.hbm_to_vmem [thread:$0]  %s913_s3, 1024, %s794_s12, [#allocation3], %s739_s21, %s739_s21, %s740_s22  }
  0x22   :  { %s741_s14 = smov [#allocation6]   ;;  %s711_s18 = scalar_lea.hbm %s917_s7, 1024 }
  0x23   :  { %s55_s15 = sshll.u32 %s741_s14, 4  ;;  %p712_p2 = scmp.ne.s32.totalorder %s917_s7, %s711_s18  ;;  %s56_s15 = int_to_ptr.vmem [resolvable:$true] %s55_s15 }
  0x24   :  { %p715_p3 = scmp.lt.u32.totalorder %s711_s18, %s917_s7 }
  0x26   :  { %p717_p4 = pnand %p715_p3, %p712_p2 }
  0x28   :  { %720 = shalt.err (!%p717_p4)
}
  0x29   :  { %s721_s25 = scalar_lea.vmem %s56_s15, 1024  ;;  %p726_p6 = scmp.lt.s32.totalorder %s56_s15, %s56_s15 }
  0x2a   :  { %p722_p5 = scmp.ne.s32.totalorder %s56_s15, %s721_s25  ;;  %p727_p7 = scmp.lt.s32.totalorder %s721_s25, %s721_s25 }
  0x2c   :  { %p728_p8 = por %p727_p7, %p726_p6 }
  0x2e   :  { %p729_p9 = pnand %p728_p8, %p722_p5 }
  0x30   :  { %732 = shalt.err (!%p729_p9)
}
  0x31   :  { %61 = dma.hbm_to_vmem [thread:$0]  %s917_s7, 1024, %s56_s15, [#allocation5], %s739_s21, %s739_s21, %s740_s22  }
  0x32   :  { %733 = dma.done.wait [#allocation3], 1024  }
  0x33   :  { %734 = vsyncadd [#allocation3], 4294966272 }
  0x34   :  { %735 = dma.done.wait [#allocation5], 2048  }
  0x35   :  { %736 = vsyncadd [#allocation5], 4294965248  ;;  %v742_v0 = vmov 0.0   ;;  %vm743_vm0 = vmmov 0   ;;  %v637_v1 = vld [vmem:[%s911_s1] sm:$0xff]   ;;  %v638_v2 = vld [vmem:[%s911_s1 + $0x8] sm:$0xff]  }
  0x36   :  { %562 = vmatprep.subr.bf16.mxu0 %v742_v0  ;;  %566 = vmatprep.mubr.msk.bf16.mxu0 %vm743_vm0, %v742_v0  ;;  %v74_v3 = vld [vmem:[%s910_s0] sm:$0xff]  ;;  %v75_v4 = vld [vmem:[%s910_s0 + $0x8] sm:$0xff]  ;;  %vm100_vm1 = vcmask 261120   ;;  %v641_v8 = vld [vmem:[#allocation2 + $0x10] sm:$0xff]   ;;  %vm492_vm2 = vcmask 31744  }
  0x37   :  { %570 = vmatprep.subr.bf16.mxu1 %v742_v0  ;;  %586 = vmatprep.mubr.msk.bf16.mxu1 %vm743_vm0, %v742_v0  ;;  %v639_v5 = vld [vmem:[#allocation2] sm:$0xff]   ;;  %v76_v6 = vpack.c.bf16 %v75_v4, %v74_v3  ;;  %v640_v7 = vld [vmem:[#allocation2 + $0x8] sm:$0xff]   ;;  %v642_v9 = vld [vmem:[#allocation2 + $0x18] sm:$0xff]  }
  0x38   :  { %563 = vmatpush3.bf16.msra.mxu0 %v637_v1  ;;  %571 = vmatpush3.bf16.msra.mxu1 %v639_v5  ;;  %v643_v10 = vld [vmem:[#allocation2 + $0x20] sm:$0xff]   ;;  %v644_v11 = vld [vmem:[#allocation2 + $0x28] sm:$0xff]   ;;  %v645_v12 = vld [vmem:[#allocation2 + $0x30] sm:$0xff]  }
  0x39   :  { %564 = vmatprep.subr.bf16.mxu0 %v742_v0  ;;  %572 = vmatprep.subr.bf16.mxu1 %v742_v0  ;;  %v646_v13 = vld [vmem:[#allocation2 + $0x38] sm:$0xff]   ;;  %v647_v14 = vld [vmem:[#allocation4] sm:$0xff]   ;;  %v648_v15 = vld [vmem:[#allocation4 + $0x8] sm:$0xff]  }
  0x3a   :  { %v649_v16 = vld [vmem:[#allocation4 + $0x10] sm:$0xff]   ;;  %v650_v17 = vld [vmem:[#allocation4 + $0x18] sm:$0xff]   ;;  %v651_v18 = vld [vmem:[#allocation4 + $0x20] sm:$0xff]  }
  0x3b   :  { %v652_v19 = vld [vmem:[#allocation4 + $0x28] sm:$0xff]   ;;  %v501_v20 = vld [vmem:[%s912_s2] ss:$0 sm:$0xff]  ;;  %v653_v30 = vld [vmem:[#allocation4 + $0x30] sm:$0xff]  }
  0x3c   :  { %565 = vmatpush3.bf16.msra.mxu0 %v638_v2  ;;  %573 = vmatpush3.bf16.msra.mxu1 %v640_v7  ;;  %v654_v31 = vld [vmem:[#allocation4 + $0x38] sm:$0xff]   ;;  %v655_v32 = vld [vmem:[#allocation6] sm:$0xff]   ;;  %v656_v33 = vld [vmem:[#allocation6 + $0x8] sm:$0xff]  }
  0x3d   :  { %590 = vmatprep.subr.bf16.mxu0 %v742_v0  ;;  %574 = vmatprep.subr.bf16.mxu1 %v742_v0  ;;  %v657_v34 = vld [vmem:[#allocation6 + $0x10] sm:$0xff]   ;;  %v658_v35 = vld [vmem:[#allocation6 + $0x18] sm:$0xff]   ;;  %v659_v36 = vld [vmem:[#allocation6 + $0x20] sm:$0xff]  }
  0x3e   :  { %v660_v37 = vld [vmem:[#allocation6 + $0x28] sm:$0xff]   ;;  %v505_v38 = vld [vmem:[%s914_s4] ss:$0 sm:$0xff]  ;;  %v661_v48 = vld [vmem:[#allocation6 + $0x30] sm:$0xff]  }
  0x3f   :  { %567 = vmatmul.mubr.msk.bf16.vlgmr.msra.gmra.mrb[0].mxu0 %vm100_vm1, %v76_v6  ;;  %v662_v49 = vld [vmem:[#allocation6 + $0x38] sm:$0xff]   ;;  %v514_v50 = vld [vmem:[%s916_s6] ss:$0 sm:$0xff] }
  0x40   :  { %606 = vmatprep.mubr.msk.bf16.mxu0 %vm743_vm0, %v742_v0  ;;  %575 = vmatpush3.bf16.msra.mxu1 %v641_v8  ;;  %v523_v60 = vld [vmem:[%s918_s8] ss:$0 sm:$0xff] }
  0x41   :  { %576 = vmatprep.subr.bf16.mxu1 %v742_v0  ;;  %591 = vmatpush3.bf16.msra.mxu0 %v647_v14 }
  0x42   :  { %592 = vmatprep.subr.bf16.mxu0 %v742_v0 }
  0x44   :  { %577 = vmatpush3.bf16.msra.mxu1 %v642_v9 }
  0x45   :  { %578 = vmatprep.subr.bf16.mxu1 %v742_v0  ;;  %593 = vmatpush3.bf16.msra.mxu0 %v648_v15 }
  0x46   :  { %594 = vmatprep.subr.bf16.mxu0 %v742_v0 }
  0x48   :  { %579 = vmatpush3.bf16.msra.mxu1 %v643_v10 }
  0x49   :  { %580 = vmatprep.subr.bf16.mxu1 %v742_v0  ;;  %595 = vmatpush3.bf16.msra.mxu0 %v649_v16 }
  0x4a   :  { %596 = vmatprep.subr.bf16.mxu0 %v742_v0 }
  0x4c   :  { %581 = vmatpush3.bf16.msra.mxu1 %v644_v11 }
  0x4d   :  { %582 = vmatprep.subr.bf16.mxu1 %v742_v0  ;;  %597 = vmatpush3.bf16.msra.mxu0 %v650_v17 }
  0x4e   :  { %598 = vmatprep.subr.bf16.mxu0 %v742_v0 }
  0x50   :  { %583 = vmatpush3.bf16.msra.mxu1 %v645_v12 }
  0x51   :  { %584 = vmatprep.subr.bf16.mxu1 %v742_v0  ;;  %599 = vmatpush3.bf16.msra.mxu0 %v651_v18 }
  0x52   :  { %600 = vmatprep.subr.bf16.mxu0 %v742_v0 }
  0x54   :  { %585 = vmatpush3.bf16.msra.mxu1 %v646_v13 }
  0x55   :  { %610 = vmatprep.subr.bf16.mxu1 %v742_v0  ;;  %601 = vmatpush3.bf16.msra.mxu0 %v652_v19 }
  0x56   :  { %602 = vmatprep.subr.bf16.mxu0 %v742_v0 }
  0x59   :  { %603 = vmatpush3.bf16.msra.mxu0 %v653_v30 }
  0x5a   :  { %604 = vmatprep.subr.bf16.mxu0 %v742_v0 }
  0x5d   :  { %605 = vmatpush3.bf16.msra.mxu0 %v654_v31 }
 0x112   :  { %v138_v21 = vpop.f32.mrb[0].mxu0 }
 0x113   :  { %v139_v22 = vadd.f32 %v501_v20, %v138_v21  ;;  %v568_v23 = vpop.f32.mrb[1].mxu0 }
 0x114   :  { %v141_v24 = vpop.f32.mrb[2].mxu0 }
 0x115   :  { %v142_v25 = vadd.f32 %v501_v20, %v141_v24  ;;  %v569_v26 = vpop.f32.mrb[3].mxu0  ;;  %v145_v27 = vmax.f32 %v139_v22, 0.0 }
 0x117   :  { %v146_v28 = vmax.f32 %v142_v25, 0.0 }
 0x119   :  { %v147_v29 = vpack.c.bf16 %v146_v28, %v145_v27 }
 0x11b   :  { %587 = vmatmul.mubr.bf16.vlgmr.msra.gmra.mrb[0].mxu1 %v147_v29 }
 0x11c   :  { %626 = vmatprep.mubr.msk.bf16.mxu1 %vm743_vm0, %v742_v0  ;;  %611 = vmatpush3.bf16.msra.mxu1 %v655_v32 }
 0x11d   :  { %612 = vmatprep.subr.bf16.mxu1 %v742_v0 }
 0x120   :  { %613 = vmatpush3.bf16.msra.mxu1 %v656_v33 }
 0x121   :  { %614 = vmatprep.subr.bf16.mxu1 %v742_v0 }
 0x124   :  { %615 = vmatpush3.bf16.msra.mxu1 %v657_v34 }
 0x125   :  { %616 = vmatprep.subr.bf16.mxu1 %v742_v0 }
 0x128   :  { %617 = vmatpush3.bf16.msra.mxu1 %v658_v35 }
 0x129   :  { %618 = vmatprep.subr.bf16.mxu1 %v742_v0 }
 0x12c   :  { %619 = vmatpush3.bf16.msra.mxu1 %v659_v36 }
 0x12d   :  { %620 = vmatprep.subr.bf16.mxu1 %v742_v0 }
 0x130   :  { %621 = vmatpush3.bf16.msra.mxu1 %v660_v37 }
 0x131   :  { %622 = vmatprep.subr.bf16.mxu1 %v742_v0 }
 0x134   :  { %623 = vmatpush3.bf16.msra.mxu1 %v661_v48 }
 0x135   :  { %624 = vmatprep.subr.bf16.mxu1 %v742_v0 }
 0x138   :  { %625 = vmatpush3.bf16.msra.mxu1 %v662_v49 }
 0x1ee   :  { %v253_v39 = vpop.f32.mrb[0].mxu1 }
 0x1ef   :  { %v254_v40 = vadd.f32 %v505_v38, %v253_v39  ;;  %v588_v41 = vpop.f32.mrb[1].mxu1 }
 0x1f0   :  { %v256_v42 = vpop.f32.mrb[2].mxu1 }
 0x1f1   :  { %v257_v43 = vadd.f32 %v505_v38, %v256_v42  ;;  %v589_v44 = vpop.f32.mrb[3].mxu1  ;;  %v260_v45 = vmax.f32 %v254_v40, 0.0 }
 0x1f3   :  { %v261_v46 = vmax.f32 %v257_v43, 0.0 }
 0x1f5   :  { %v262_v47 = vpack.c.bf16 %v261_v46, %v260_v45 }
 0x1f7   :  { %607 = vmatmul.mubr.bf16.vlgmr.msra.gmra.mrb[4].mxu0 %v262_v47 }
 0x2ca   :  { %v368_v51 = vpop.f32.mrb[4].mxu0 }
 0x2cb   :  { %v369_v52 = vadd.f32 %v514_v50, %v368_v51  ;;  %v608_v53 = vpop.f32.mrb[5].mxu0 }
 0x2cc   :  { %v371_v54 = vpop.f32.mrb[6].mxu0 }
 0x2cd   :  { %v372_v55 = vadd.f32 %v514_v50, %v371_v54  ;;  %v609_v56 = vpop.f32.mrb[7].mxu0  ;;  %v375_v57 = vmax.f32 %v369_v52, 0.0 }
 0x2cf   :  { %v376_v58 = vmax.f32 %v372_v55, 0.0 }
 0x2d1   :  { %v377_v59 = vpack.c.bf16 %v376_v58, %v375_v57 }
 0x2d3   :  { %627 = vmatmul.mubr.bf16.vlgmr.msra.gmra.mrb[4].mxu1 %v377_v59 }
 0x3a6   :  { %v483_v61 = vpop.f32.mrb[4].mxu1 }
 0x3a7   :  { %v484_v62 = vadd.f32 %v523_v60, %v483_v61  ;;  %v628_v63 = vpop.f32.mrb[5].mxu1 }
 0x3a8   :  { %v486_v0 = vpop.f32.mrb[6].mxu1 }
 0x3a9   :  { %663 = vtanh.f32 %v484_v62  ;;  %v487_v1 = vadd.f32 %v523_v60, %v486_v0  ;;  %v629_v2 = vpop.f32.mrb[7].mxu1 }
 0x3ab   :  { %665 = vtanh.f32 %v487_v1 }
 0x3b3   :  { %v664_v3 = vpop.eup %663 }
 0x3b4   :  { %493 = vst.msk [vmem:[%s919_s9] sm:$0xff] %vm492_vm2, %v664_v3 }
 0x3b5   :  { %v666_v4 = vpop.eup %665 }
 0x3b6   :  { %494 = vst.msk [vmem:[%s919_s9 + $0x8] sm:$0xff] %vm492_vm2, %v666_v4 }
 0x3b7   :  { %499 = vsyncpa [#allocation3], 1 }
 0x3b8   :  { %500 = vsyncpa [#allocation5], 1 }

</bundles_post_ra>
